<compile_context>
chip_gen: v7x
topology: tpu7x:2x2x1
jax: 0.10.0
libtpu: 0.0.40
codegen_flags: <defaults>
</compile_context>

<pallas_src>
import jax
import jax.numpy as jnp
from jax.experimental import pallas as pl
from jax.experimental.pallas import tpu as pltpu

_EPS = 1e-8


def _round_up(x, m):
    return ((x + m - 1) // m) * m


# ----------------------------------------------------------------------------- kernel
def _gvp_kernel(
    s_ref,      # (BLK, si)
    v_ref,      # (3, BLK, vi)
    wh_ref,     # (vi, h)
    wss_ref,    # (si, so)   -- Ws weight, scalar part
    wsn_ref,    # (h,  so)   -- Ws weight, vector-norm part
    wsb_ref,    # (1,  so)   -- Ws bias
    wv_ref,     # (h,  vo)
    wsvw_ref,   # (so, vo)   -- Wsv weight
    wsvb_ref,   # (1,  vo)   -- Wsv bias
    s_out_ref,  # (BLK, so)
    v_out_ref,  # (3, BLK, vo)
):
    blk = v_ref.shape[1]
    vi = v_ref.shape[2]
    h = wh_ref.shape[1]
    vo = wv_ref.shape[1]

    # One fused (3*blk, vi) @ (vi, h) matmul covers all three xyz components.
    # blk % 8 == 0 -> collapsing (3, blk, vi) to (3*blk, vi) is copy-free.
    v_flat = v_ref[...].reshape(3 * blk, vi)
    vh = jnp.dot(v_flat, wh_ref[...], preferred_element_type=jnp.float32)   # (3*blk, h) f32
    vh3 = vh.reshape(3, blk, h)

    # L2 norm over xyz: clamp the squared norm at eps (matches _norm_no_nan), f32.
    vn = jnp.sqrt(jnp.maximum(jnp.sum(vh3 * vh3, axis=0), _EPS))            # (blk, h)

    # s_pre = Ws [s ; vn] + b   (concat expressed as two matmuls), f32 accumulation.
    s_pre = (
        jnp.dot(s_ref[...], wss_ref[...], preferred_element_type=jnp.float32)
        + jnp.dot(vn, wsn_ref[...], preferred_element_type=jnp.float32)
        + wsb_ref[...].astype(jnp.float32)
    )

    # Vector gate: sigmoid(Wsv sigmoid(s_pre) + b), all in f32 (EUP).
    gate = jax.nn.sigmoid(
        jnp.dot(jax.nn.sigmoid(s_pre), wsvw_ref[...], preferred_element_type=jnp.float32)
        + wsvb_ref[...].astype(jnp.float32)
    )

    s_out_ref[...] = jax.nn.relu(s_pre).astype(s_out_ref.dtype)

    # One fused (3*blk, h) @ (h, vo) matmul + a single contiguous (3, blk, vo) store.
    v_out = jnp.dot(vh, wv_ref[...], preferred_element_type=jnp.float32).reshape(3, blk, vo)
    v_out_ref[...] = (v_out * gate[None, :, :]).astype(v_out_ref.dtype)


# ----------------------------------------------------------------------------- wrappers
def gvp_forward_xyz_major(params, s, v_xyz, *, block_rows=2048):
    """GVP forward in xyz-major layout (no per-layer transposes).

    s: (N, si), v_xyz: (3, N, vi)  ->  (s_out (N, so), v_out (3, N, vo)).
    Stacked GVP networks should keep activations in this layout end-to-end.
    """
    wh, wss, wsn, wsb, wv, wsvw, wsvb = params
    N, si = s.shape
    vi = v_xyz.shape[2]
    h = wh.shape[1]
    so = wss.shape[1]
    vo = wv.shape[1]

    # Row tile: 8-aligned, capped at (8-padded) N. Pad only to a multiple of 8 and
    # let Pallas handle the ragged last block -> no round-up-to-blk waste.
    n_pad = _round_up(N, 8)
    blk = max(8, min(_round_up(block_rows, 8), n_pad))
    if n_pad != N:
        s = jnp.pad(s, ((0, n_pad - N), (0, 0)))
        v_xyz = jnp.pad(v_xyz, ((0, 0), (0, n_pad - N), (0, 0)))

    grid = (pl.cdiv(n_pad, blk),)

    s_out, v_out_xyz = pl.pallas_call(
        _gvp_kernel,
        out_shape=(
            jax.ShapeDtypeStruct((n_pad, so), s.dtype),
            jax.ShapeDtypeStruct((3, n_pad, vo), v_xyz.dtype),
        ),
        grid_spec=pltpu.PrefetchScalarGridSpec(
            num_scalar_prefetch=0,
            grid=grid,
            in_specs=[
                pl.BlockSpec((blk, si), lambda i: (i, 0)),
                pl.BlockSpec((3, blk, vi), lambda i: (0, i, 0)),
                # Weights / biases: constant full-extent blocks (no re-DMA across steps).
                pl.BlockSpec((vi, h), lambda i: (0, 0)),
                pl.BlockSpec((si, so), lambda i: (0, 0)),
                pl.BlockSpec((h, so), lambda i: (0, 0)),
                pl.BlockSpec((1, so), lambda i: (0, 0)),
                pl.BlockSpec((h, vo), lambda i: (0, 0)),
                pl.BlockSpec((so, vo), lambda i: (0, 0)),
                pl.BlockSpec((1, vo), lambda i: (0, 0)),
            ],
            out_specs=[
                pl.BlockSpec((blk, so), lambda i: (i, 0)),
                pl.BlockSpec((3, blk, vo), lambda i: (0, i, 0)),
            ],
        ),
        compiler_params=pltpu.CompilerParams(
            dimension_semantics=("parallel",),
            vmem_limit_bytes=64 * 1024 * 1024,
        ),
    )(s, v_xyz, wh, wss, wsn, wsb, wv, wsvw, wsvb)

    if n_pad != N:
        s_out = s_out[:N]
        v_out_xyz = v_out_xyz[:, :N]
    return s_out, v_out_xyz


def gvp_forward(params, s, v, *, block_rows=2048):
    """PyTorch-layout wrapper: v is (N, vi, 3) -> (s_out (N, so), v_out (N, vo, 3)).

    Transposes only at the module boundary; for stacked GVPs use
    gvp_forward_xyz_major to avoid the per-layer layout round trip.
    """
    v_xyz = jnp.transpose(v, (2, 0, 1))                        # (3, N, vi)
    s_out, v_out_xyz = gvp_forward_xyz_major(params, s, v_xyz, block_rows=block_rows)
    return s_out, jnp.transpose(v_out_xyz, (1, 2, 0))          # (N, vo, 3)


def gvp_reference(params, s, v):
    """Pure-JAX reference matching the PyTorch GVP.forward (default config)."""
    wh, wss, wsn, wsb, wv, wsvw, wsvb = params
    vt = jnp.swapaxes(v, -1, -2)                                   # (N, 3, vi)
    vh = vt @ wh                                                   # (N, 3, h)
    vn = jnp.sqrt(jnp.maximum(jnp.sum(vh * vh, axis=-2), _EPS))    # (N, h)
    s_pre = s @ wss + vn @ wsn + wsb                               # (N, so)
    v_out = jnp.swapaxes(vh @ wv, -1, -2)                          # (N, vo, 3)
    gate = jax.nn.sigmoid(jax.nn.sigmoid(s_pre) @ wsvw + wsvb)     # (N, vo)
    v_out = v_out * gate[..., None]
    return jax.nn.relu(s_pre), v_out


# ----------------------------------------------------------------------------- module
class GVP:
    """
    Geometric Vector Perceptron (JAX/Pallas). Default PyTorch config:
    activations=(relu, sigmoid), vector_gate=True, vi > 0 and vo > 0.
    Weights are stored (in, out); ws's weight is pre-split into its [s ; vn] parts.
    """

    def __init__(self, in_dims, out_dims, h_dim=None, *, key, dtype=jnp.float32):
        self.si, self.vi = in_dims
        self.so, self.vo = out_dims
        if not (self.vi and self.vo):
            # TODO(synk): vi==0 / vo==0 branches (plain Linear path / zero-vector output)
            # and non-default activations / vector_gate=False are not implemented.
            raise NotImplementedError(
                "Only the default GVP config (vi>0, vo>0, vector_gate) is implemented.")
        self.h = h_dim or max(self.vi, self.vo)

        ks = jax.random.split(key, 7)

        def lin(k, fan_in, shape):
            bound = 1.0 / (fan_in ** 0.5)
            return jax.random.uniform(k, shape, dtype, -bound, bound)

        self.wh = lin(ks[0], self.vi, (self.vi, self.h))                 # wh (no bias)
        self.wss = lin(ks[1], self.h + self.si, (self.si, self.so))      # ws weight (s part)
        self.wsn = lin(ks[2], self.h + self.si, (self.h, self.so))       # ws weight (vn part)
        self.wsb = lin(ks[3], self.h + self.si, (1, self.so))            # ws bias
        self.wv = lin(ks[4], self.h, (self.h, self.vo))                  # wv (no bias)
        self.wsvw = lin(ks[5], self.so, (self.so, self.vo))              # wsv weight
        self.wsvb = lin(ks[6], self.so, (1, self.vo))                    # wsv bias

    def params(self):
        return (self.wh, self.wss, self.wsn, self.wsb, self.wv, self.wsvw, self.wsvb)

    def __call__(self, x, *, block_rows=2048):
        s, v = x
        return gvp_forward(self.params(), s, v, block_rows=block_rows)

    def forward_xyz_major(self, s, v_xyz, *, block_rows=2048):
        return gvp_forward_xyz_major(self.params(), s, v_xyz, block_rows=block_rows)

    def reference(self, x):
        s, v = x
        return gvp_reference(self.params(), s, v)


# ----------------------------------------------------------------------------- demo
if __name__ == "__main__":
    key = jax.random.PRNGKey(0)
    k_s, k_v, k_p, k_s2, k_v2 = jax.random.split(key, 5)

    # Small shapes: 64 nodes, 32 scalar channels in/out, 16 vector channels in/out.
    N, SI, VI = 64, 32, 16
    SO, VO = 32, 16

    s = jax.random.normal(k_s, (N, SI), dtype=jnp.float32)
    v = jax.random.normal(k_v, (N, VI, 3), dtype=jnp.float32)

    gvp = GVP((SI, VI), (SO, VO), key=k_p)

    # --- path 1: PyTorch layout (transpose only at the boundary) -----------------
    s_out, v_out = gvp((s, v))
    s_out = jax.block_until_ready(s_out)
    v_out = jax.block_until_ready(v_out)
    assert s_out.shape == (N, SO) and v_out.shape == (N, VO, 3)

    s_ref, v_ref = gvp.reference((s, v))
    # Tolerance covers MXU/XLA default f32 matmul precision differences.
    assert bool(jnp.allclose(s_out, s_ref, rtol=2e-2, atol=2e-2)), "scalar output mismatch"
    assert bool(jnp.allclose(v_out, v_ref, rtol=2e-2, atol=2e-2)), "vector output mismatch"
    assert bool(jnp.all(s_out >= 0.0))   # relu

    # --- path 2: xyz-major layout, multi-step grid with a ragged last block ------
    N2 = 200
    s2 = jax.random.normal(k_s2, (N2, SI), dtype=jnp.float32)
    v2 = jax.random.normal(k_v2, (N2, VI, 3), dtype=jnp.float32)
    v2_xyz = jnp.transpose(v2, (2, 0, 1))

    s2_out, v2_out_xyz = gvp.forward_xyz_major(s2, v2_xyz, block_rows=64)
    s2_out = jax.block_until_ready(s2_out)
    v2_out_xyz = jax.block_until_ready(v2_out_xyz)
    assert s2_out.shape == (N2, SO) and v2_out_xyz.shape == (3, N2, VO)

    s2_ref, v2_ref = gvp.reference((s2, v2))
    v2_out = jnp.transpose(v2_out_xyz, (1, 2, 0))
    assert bool(jnp.allclose(s2_out, s2_ref, rtol=2e-2, atol=2e-2)), "scalar output mismatch (ragged)"
    assert bool(jnp.allclose(v2_out, v2_ref, rtol=2e-2, atol=2e-2)), "vector output mismatch (ragged)"

    print("KERNEL_OK")
</pallas_src>

<mosaic_0001>
module attributes {stable_mosaic.version = 11 : i64} {
  func.func @_gvp_kernel(%arg0: i32, %arg1: memref<64x32xf32, #tpu.memory_space<vmem>>, %arg2: memref<3x64x16xf32, #tpu.memory_space<vmem>>, %arg3: memref<16x16xf32, #tpu.memory_space<vmem>>, %arg4: memref<32x32xf32, #tpu.memory_space<vmem>>, %arg5: memref<16x32xf32, #tpu.memory_space<vmem>>, %arg6: memref<1x32xf32, #tpu.memory_space<vmem>>, %arg7: memref<16x16xf32, #tpu.memory_space<vmem>>, %arg8: memref<32x16xf32, #tpu.memory_space<vmem>>, %arg9: memref<1x16xf32, #tpu.memory_space<vmem>>, %arg10: memref<64x32xf32, #tpu.memory_space<vmem>>, %arg11: memref<3x64x16xf32, #tpu.memory_space<vmem>>) attributes {dimension_semantics = [#tpu.dimension_semantics<parallel>], iteration_bounds = array<i64: 1>, scalar_prefetch = 0 : i64, scratch_operands = 0 : i64, tpu.core_type = #tpu.core_type<tc>, window_params = [{transform_indices = @transform_0, window_bounds = array<i64: 64, 32>}, {transform_indices = @transform_1, window_bounds = array<i64: 3, 64, 16>}, {pipeline_mode = #tpu.pipeline_mode<synchronous>, transform_indices = @transform_2, window_bounds = array<i64: 16, 16>}, {pipeline_mode = #tpu.pipeline_mode<synchronous>, transform_indices = @transform_3, window_bounds = array<i64: 32, 32>}, {pipeline_mode = #tpu.pipeline_mode<synchronous>, transform_indices = @transform_4, window_bounds = array<i64: 16, 32>}, {pipeline_mode = #tpu.pipeline_mode<synchronous>, transform_indices = @transform_5, window_bounds = array<i64: 1, 32>}, {pipeline_mode = #tpu.pipeline_mode<synchronous>, transform_indices = @transform_6, window_bounds = array<i64: 16, 16>}, {pipeline_mode = #tpu.pipeline_mode<synchronous>, transform_indices = @transform_7, window_bounds = array<i64: 32, 16>}, {pipeline_mode = #tpu.pipeline_mode<synchronous>, transform_indices = @transform_8, window_bounds = array<i64: 1, 16>}, {transform_indices = @transform_9, window_bounds = array<i64: 64, 32>}, {transform_indices = @transform_10, window_bounds = array<i64: 3, 64, 16>}]} {
    %c0 = arith.constant 0 : index
    %c0_0 = arith.constant 0 : index
    %c0_1 = arith.constant 0 : index
    %0 = vector.load %arg2[%c0, %c0_0, %c0_1] : memref<3x64x16xf32, #tpu.memory_space<vmem>>, vector<3x64x16xf32>
    %1 = vector.shape_cast %0 : vector<3x64x16xf32> to vector<192x16xf32>
    %c0_2 = arith.constant 0 : index
    %c0_3 = arith.constant 0 : index
    %2 = vector.load %arg3[%c0_2, %c0_3] : memref<16x16xf32, #tpu.memory_space<vmem>>, vector<16x16xf32>
    %cst = arith.constant dense<0.000000e+00> : vector<192x16xf32>
    %3 = tpu.matmul %1, %2, %cst {dimension_numbers = #tpu.dot_dimension_numbers<[1], [0], [0], [1], [0, 0, 1, 1], [], []>} : vector<192x16xf32>, vector<16x16xf32>, vector<192x16xf32> -> vector<192x16xf32>
    %4 = vector.shape_cast %3 : vector<192x16xf32> to vector<3x64x16xf32>
    %5 = arith.mulf %4, %4 : vector<3x64x16xf32>
    %cst_4 = arith.constant dense<0.000000e+00> : vector<64x16xf32>
    %6 = vector.multi_reduction <add>, %5, %cst_4 [0] : vector<3x64x16xf32> to vector<64x16xf32>
    %cst_5 = arith.constant 9.99999993E-9 : f32
    %7 = vector.broadcast %cst_5 : f32 to vector<64x16xf32>
    %8 = arith.maximumf %6, %7 : vector<64x16xf32>
    %9 = math.sqrt %8 : vector<64x16xf32>
    %c0_6 = arith.constant 0 : index
    %c0_7 = arith.constant 0 : index
    %10 = vector.load %arg1[%c0_6, %c0_7] : memref<64x32xf32, #tpu.memory_space<vmem>>, vector<64x32xf32>
    %c0_8 = arith.constant 0 : index
    %c0_9 = arith.constant 0 : index
    %11 = vector.load %arg4[%c0_8, %c0_9] : memref<32x32xf32, #tpu.memory_space<vmem>>, vector<32x32xf32>
    %cst_10 = arith.constant dense<0.000000e+00> : vector<64x32xf32>
    %12 = tpu.matmul %10, %11, %cst_10 {dimension_numbers = #tpu.dot_dimension_numbers<[1], [0], [0], [1], [0, 0, 1, 1], [], []>} : vector<64x32xf32>, vector<32x32xf32>, vector<64x32xf32> -> vector<64x32xf32>
    %c0_11 = arith.constant 0 : index
    %c0_12 = arith.constant 0 : index
    %13 = vector.load %arg5[%c0_11, %c0_12] : memref<16x32xf32, #tpu.memory_space<vmem>>, vector<16x32xf32>
    %cst_13 = arith.constant dense<0.000000e+00> : vector<64x32xf32>
    %14 = tpu.matmul %9, %13, %cst_13 {dimension_numbers = #tpu.dot_dimension_numbers<[1], [0], [0], [1], [0, 0, 1, 1], [], []>} : vector<64x16xf32>, vector<16x32xf32>, vector<64x32xf32> -> vector<64x32xf32>
    %15 = arith.addf %12, %14 : vector<64x32xf32>
    %c0_14 = arith.constant 0 : index
    %c0_15 = arith.constant 0 : index
    %16 = vector.load %arg6[%c0_14, %c0_15] : memref<1x32xf32, #tpu.memory_space<vmem>>, vector<1x32xf32>
    %17 = vector.broadcast %16 : vector<1x32xf32> to vector<64x32xf32>
    %18 = arith.addf %15, %17 : vector<64x32xf32>
    %19 = arith.negf %18 : vector<64x32xf32>
    %20 = math.exp %19 : vector<64x32xf32>
    %cst_16 = arith.constant 1.000000e+00 : f32
    %21 = vector.broadcast %cst_16 : f32 to vector<64x32xf32>
    %22 = arith.addf %21, %20 : vector<64x32xf32>
    %23 = arith.divf %21, %22 : vector<64x32xf32>
    %c0_17 = arith.constant 0 : index
    %c0_18 = arith.constant 0 : index
    %24 = vector.load %arg8[%c0_17, %c0_18] : memref<32x16xf32, #tpu.memory_space<vmem>>, vector<32x16xf32>
    %cst_19 = arith.constant dense<0.000000e+00> : vector<64x16xf32>
    %25 = tpu.matmul %23, %24, %cst_19 {dimension_numbers = #tpu.dot_dimension_numbers<[1], [0], [0], [1], [0, 0, 1, 1], [], []>} : vector<64x32xf32>, vector<32x16xf32>, vector<64x16xf32> -> vector<64x16xf32>
    %c0_20 = arith.constant 0 : index
    %c0_21 = arith.constant 0 : index
    %26 = vector.load %arg9[%c0_20, %c0_21] : memref<1x16xf32, #tpu.memory_space<vmem>>, vector<1x16xf32>
    %27 = vector.broadcast %26 : vector<1x16xf32> to vector<64x16xf32>
    %28 = arith.addf %25, %27 : vector<64x16xf32>
    %29 = arith.negf %28 : vector<64x16xf32>
    %30 = math.exp %29 : vector<64x16xf32>
    %cst_22 = arith.constant 1.000000e+00 : f32
    %31 = vector.broadcast %cst_22 : f32 to vector<64x16xf32>
    %32 = arith.addf %31, %30 : vector<64x16xf32>
    %33 = arith.divf %31, %32 : vector<64x16xf32>
    %cst_23 = arith.constant 0.000000e+00 : f32
    %34 = vector.broadcast %cst_23 : f32 to vector<64x32xf32>
    %35 = arith.maximumf %18, %34 : vector<64x32xf32>
    %c0_24 = arith.constant 0 : index
    %c0_25 = arith.constant 0 : index
    %36 = vector.load %arg10[%c0_24, %c0_25] : memref<64x32xf32, #tpu.memory_space<vmem>>, vector<64x32xf32>
    tpu.vector_store %arg10[%c0_24, %c0_25], %35 {strides = array<i32>} : memref<64x32xf32, #tpu.memory_space<vmem>>, vector<64x32xf32>,
    %c0_26 = arith.constant 0 : index
    %c0_27 = arith.constant 0 : index
    %37 = vector.load %arg7[%c0_26, %c0_27] : memref<16x16xf32, #tpu.memory_space<vmem>>, vector<16x16xf32>
    %cst_28 = arith.constant dense<0.000000e+00> : vector<192x16xf32>
    %38 = tpu.matmul %3, %37, %cst_28 {dimension_numbers = #tpu.dot_dimension_numbers<[1], [0], [0], [1], [0, 0, 1, 1], [], []>} : vector<192x16xf32>, vector<16x16xf32>, vector<192x16xf32> -> vector<192x16xf32>
    %39 = vector.shape_cast %38 : vector<192x16xf32> to vector<3x64x16xf32>
    %40 = vector.shape_cast %33 : vector<64x16xf32> to vector<1x64x16xf32>
    %41 = vector.broadcast %40 : vector<1x64x16xf32> to vector<3x64x16xf32>
    %42 = arith.mulf %39, %41 : vector<3x64x16xf32>
    %c0_29 = arith.constant 0 : index
    %c0_30 = arith.constant 0 : index
    %c0_31 = arith.constant 0 : index
    %43 = vector.load %arg11[%c0_29, %c0_30, %c0_31] : memref<3x64x16xf32, #tpu.memory_space<vmem>>, vector<3x64x16xf32>
    tpu.vector_store %arg11[%c0_29, %c0_30, %c0_31], %42 {strides = array<i32>} : memref<3x64x16xf32, #tpu.memory_space<vmem>>, vector<3x64x16xf32>,
    return
  }
  func.func @transform_0(%arg0: i32) -> (i32, i32) {
    %c0_i32 = arith.constant 0 : i32
    %c0_i32_0 = arith.constant 0 : i32
    return %arg0, %c0_i32 : i32, i32
  }
  func.func @transform_1(%arg0: i32) -> (i32, i32, i32) {
    %c0_i32 = arith.constant 0 : i32
    %c0_i32_0 = arith.constant 0 : i32
    %c0_i32_1 = arith.constant 0 : i32
    return %c0_i32, %arg0, %c0_i32_0 : i32, i32, i32
  }
  func.func @transform_2(%arg0: i32) -> (i32, i32) {
    %c0_i32 = arith.constant 0 : i32
    %c0_i32_0 = arith.constant 0 : i32
    %c0_i32_1 = arith.constant 0 : i32
    return %c0_i32, %c0_i32_0 : i32, i32
  }
  func.func @transform_3(%arg0: i32) -> (i32, i32) {
    %c0_i32 = arith.constant 0 : i32
    %c0_i32_0 = arith.constant 0 : i32
    %c0_i32_1 = arith.constant 0 : i32
    return %c0_i32, %c0_i32_0 : i32, i32
  }
  func.func @transform_4(%arg0: i32) -> (i32, i32) {
    %c0_i32 = arith.constant 0 : i32
    %c0_i32_0 = arith.constant 0 : i32
    %c0_i32_1 = arith.constant 0 : i32
    return %c0_i32, %c0_i32_0 : i32, i32
  }
  func.func @transform_5(%arg0: i32) -> (i32, i32) {
    %c0_i32 = arith.constant 0 : i32
    %c0_i32_0 = arith.constant 0 : i32
    %c0_i32_1 = arith.constant 0 : i32
    return %c0_i32, %c0_i32_0 : i32, i32
  }
  func.func @transform_6(%arg0: i32) -> (i32, i32) {
    %c0_i32 = arith.constant 0 : i32
    %c0_i32_0 = arith.constant 0 : i32
    %c0_i32_1 = arith.constant 0 : i32
    return %c0_i32, %c0_i32_0 : i32, i32
  }
  func.func @transform_7(%arg0: i32) -> (i32, i32) {
    %c0_i32 = arith.constant 0 : i32
    %c0_i32_0 = arith.constant 0 : i32
    %c0_i32_1 = arith.constant 0 : i32
    return %c0_i32, %c0_i32_0 : i32, i32
  }
  func.func @transform_8(%arg0: i32) -> (i32, i32) {
    %c0_i32 = arith.constant 0 : i32
    %c0_i32_0 = arith.constant 0 : i32
    %c0_i32_1 = arith.constant 0 : i32
    return %c0_i32, %c0_i32_0 : i32, i32
  }
  func.func @transform_9(%arg0: i32) -> (i32, i32) {
    %c0_i32 = arith.constant 0 : i32
    %c0_i32_0 = arith.constant 0 : i32
    return %arg0, %c0_i32 : i32, i32
  }
  func.func @transform_10(%arg0: i32) -> (i32, i32, i32) {
    %c0_i32 = arith.constant 0 : i32
    %c0_i32_0 = arith.constant 0 : i32
    %c0_i32_1 = arith.constant 0 : i32
    return %c0_i32, %arg0, %c0_i32_0 : i32, i32, i32
  }
}

</mosaic_0001>

<bundles_post_ra>
// kernel: tpu_custom_call.1
= control target key start
LH: loop header
LB: loop body
LE: loop exit
PB: predicated region body
PF: predicated region fallthrough
CT: control target
= control target key end

     0   :  { %16 = vsyncpa [#allocation3], 0  ;;  %s2710_s0 = inlined_call_operand.hbm [shape: f32[64,32], index: 0, kind: input, shape index: {}]   ;;  %s2711_s1 = inlined_call_operand.hbm [shape: f32[3,64,16], index: 1, kind: input, shape index: {}]   ;;  %s2712_s2 = inlined_call_operand.hbm [shape: f32[16,16], index: 2, kind: input, shape index: {}]   ;;  %s2713_s3 = inlined_call_operand.hbm [shape: f32[32,32], index: 3, kind: input, shape index: {}]   ;;  %s2714_s4 = inlined_call_operand.hbm [shape: f32[16,32], index: 4, kind: input, shape index: {}]   ;;  %s2715_s5 = inlined_call_operand.hbm [shape: f32[1,32], index: 5, kind: input, shape index: {}]   ;;  %s2716_s6 = inlined_call_operand.hbm [shape: f32[16,16], index: 6, kind: input, shape index: {}]   ;;  %s2717_s7 = inlined_call_operand.hbm [shape: f32[32,16], index: 7, kind: input, shape index: {}]   ;;  %s2718_s8 = inlined_call_operand.hbm [shape: f32[1,16], index: 8, kind: input, shape index: {}]   ;;  %s2719_s9 = inlined_call_operand.hbm [shape: f32[64,32], index: 9, kind: output, shape index: {0}]   ;;  %s2720_s10 = inlined_call_operand.hbm [shape: f32[3,64,16], index: 10, kind: output, shape index: {1}]  }
   0x1   :  { %17 = vsyncpa [#allocation6], 0 }
   0x2   :  { %18 = vsyncpa [#allocation9], 0 }
   0x3   :  { %19 = vsyncpa [#allocation12], 0 }
   0x4   :  { %20 = vsyncpa [#allocation15], 0 }
   0x5   :  { %21 = vsyncpa [#allocation4], 0 }
   0x6   :  { %22 = vsyncpa [#allocation19], 0  ;;  %s2149_s13 = smov [#allocation5]   ;;  %s2150_s15 = smov [#allocation8]  }
   0x7   :  { %s40_s14 = sshll.u32 %s2149_s13, 4  ;;  %s64_s16 = sshll.u32 %s2150_s15, 4  ;;  %s41_s14 = int_to_ptr.vmem [resolvable:$true] %s40_s14  ;;  %s2217_s16 = int_to_ptr.vmem [resolvable:$true] %s64_s16 }
   0x8   :  { %s1893_s19 = scalar_lea.hbm %s2711_s1, 3072 }
   0x9   :  { %p1894_p0 = scmp.ne.s32.totalorder %s2711_s1, %s1893_s19  ;;  %p1897_p1 = scmp.lt.u32.totalorder %s1893_s19, %s2711_s1 }
   0xb   :  { %p1899_p2 = pnand %p1897_p1, %p1894_p0 }
   0xd   :  { %1902 = shalt.err (!%p1899_p2)
}
   0xe   :  { %s1903_s24 = scalar_lea.vmem %s41_s14, 3072  ;;  %p1908_p4 = scmp.lt.s32.totalorder %s41_s14, %s41_s14 }
   0xf   :  { %p1904_p3 = scmp.ne.s32.totalorder %s41_s14, %s1903_s24  ;;  %p1909_p5 = scmp.lt.s32.totalorder %s1903_s24, %s1903_s24 }
  0x11   :  { %p1910_p6 = por %p1909_p5, %p1908_p4 }
  0x13   :  { %p1911_p7 = pnand %p1910_p6, %p1904_p3 }
  0x15   :  { %1914 = shalt.err (!%p1911_p7)
}
  0x16   :  { %s2151_s25 = smov 128   ;;  %s2152_s26 = smov 8  }
  0x17   :  { %46 = dma.hbm_to_vmem [thread:$0]  %s2711_s1, 3072, %s41_s14, [#allocation6], %s2151_s25, %s2151_s25, %s2152_s26  }
  0x18   :  { %s1915_s11 = scalar_lea.hbm %s2713_s3, 512 }
  0x19   :  { %p1916_p8 = scmp.ne.s32.totalorder %s2713_s3, %s1915_s11  ;;  %p1919_p9 = scmp.lt.u32.totalorder %s1915_s11, %s2713_s3 }
  0x1b   :  { %p1921_p10 = pnand %p1919_p9, %p1916_p8 }
  0x1d   :  { %1924 = shalt.err (!%p1921_p10)
}
  0x1e   :  { %s1925_s18 = scalar_lea.vmem %s2217_s16, 512  ;;  %p1930_p12 = scmp.lt.s32.totalorder %s2217_s16, %s2217_s16 }
  0x1f   :  { %p1926_p11 = scmp.ne.s32.totalorder %s2217_s16, %s1925_s18  ;;  %p1931_p13 = scmp.lt.s32.totalorder %s1925_s18, %s1925_s18 }
  0x21   :  { %p1932_p0 = por %p1931_p13, %p1930_p12 }
  0x23   :  { %p1933_p1 = pnand %p1932_p0, %p1926_p11 }
  0x25   :  { %1936 = shalt.err (!%p1933_p1)
}
  0x26   :  { %70 = dma.hbm_to_vmem [thread:$0]  %s2713_s3, 512, %s2217_s16, [#allocation9], %s2151_s25, %s2151_s25, %s2152_s26  }
  0x27   :  { %s2153_s19 = smov [#allocation11]   ;;  %s2154_s21 = smov [#allocation14]  }
  0x28   :  { %s89_s20 = sshll.u32 %s2153_s19, 4  ;;  %s110_s22 = sshll.u32 %s2154_s21, 4  ;;  %s90_s20 = int_to_ptr.vmem [resolvable:$true] %s89_s20  ;;  %s2254_s22 = int_to_ptr.vmem [resolvable:$true] %s110_s22 }
  0x29   :  { %s1937_s27 = scalar_lea.hbm %s2715_s5, 16 }
  0x2a   :  { %p1938_p2 = scmp.ne.s32.totalorder %s2715_s5, %s1937_s27  ;;  %p1941_p3 = scmp.lt.u32.totalorder %s1937_s27, %s2715_s5 }
  0x2c   :  { %p1943_p4 = pnand %p1941_p3, %p1938_p2 }
  0x2e   :  { %1946 = shalt.err (!%p1943_p4)
}
  0x2f   :  { %s1947_s3 = scalar_lea.vmem %s90_s20, 16  ;;  %s1951_s16 = scalar_lea.vmem %s90_s20, 32 }
  0x30   :  { %p1948_p5 = scmp.ne.s32.totalorder %s90_s20, %s1947_s3  ;;  %p1952_p6 = scmp.lt.s32.totalorder %s90_s20, %s90_s20 }
  0x31   :  { %p1953_p7 = scmp.lt.s32.totalorder %s1951_s16, %s1947_s3 }
  0x33   :  { %p1954_p8 = por %p1953_p7, %p1952_p6 }
  0x35   :  { %p1955_p9 = pnand %p1954_p8, %p1948_p5 }
  0x37   :  { %1958 = shalt.err (!%p1955_p9)
}
  0x38   :  { %92 = dma.hbm_to_vmem [thread:$0]  %s2715_s5, 16, %s90_s20, [#allocation12]  }
  0x39   :  { %s1959_s18 = scalar_lea.hbm %s2717_s7, 512 }
  0x3a   :  { %p1960_p10 = scmp.ne.s32.totalorder %s2717_s7, %s1959_s18  ;;  %p1963_p11 = scmp.lt.u32.totalorder %s1959_s18, %s2717_s7 }
  0x3c   :  { %p1965_p12 = pnand %p1963_p11, %p1960_p10 }
  0x3e   :  { %1968 = shalt.err (!%p1965_p12)
}
  0x3f   :  { %s1969_s23 = scalar_lea.vmem %s2254_s22, 512  ;;  %p1974_p0 = scmp.lt.s32.totalorder %s2254_s22, %s2254_s22 }
  0x40   :  { %p1970_p13 = scmp.ne.s32.totalorder %s2254_s22, %s1969_s23  ;;  %p1975_p1 = scmp.lt.s32.totalorder %s1969_s23, %s1969_s23 }
  0x42   :  { %p1976_p2 = por %p1975_p1, %p1974_p0 }
  0x44   :  { %p1977_p3 = pnand %p1976_p2, %p1970_p13 }
  0x46   :  { %1980 = shalt.err (!%p1977_p3)
}
  0x47   :  { %116 = dma.hbm_to_vmem [thread:$0]  %s2717_s7, 512, %s2254_s22, [#allocation15], %s2151_s25, %s2151_s25, %s2152_s26  }
  0x48   :  { %s2155_s24 = smov [#allocation2]   ;;  %s2156_s28 = smov [#allocation7]  }
  0x49   :  { %s28_s27 = sshll.u32 %s2155_s24, 4  ;;  %s52_s29 = sshll.u32 %s2156_s28, 4  ;;  %s29_s27 = int_to_ptr.vmem [resolvable:$true] %s28_s27  ;;  %s2288_s29 = int_to_ptr.vmem [resolvable:$true] %s52_s29 }
  0x4a   :  { %s1981_s3 = scalar_lea.hbm %s2710_s0, 1024 }
  0x4b   :  { %p1982_p4 = scmp.ne.s32.totalorder %s2710_s0, %s1981_s3  ;;  %p1985_p5 = scmp.lt.u32.totalorder %s1981_s3, %s2710_s0 }
  0x4d   :  { %p1987_p6 = pnand %p1985_p5, %p1982_p4 }
  0x4f   :  { %1990 = shalt.err (!%p1987_p6)
}
  0x50   :  { %s1991_s7 = scalar_lea.vmem %s29_s27, 1024  ;;  %p1996_p8 = scmp.lt.s32.totalorder %s29_s27, %s29_s27 }
  0x51   :  { %p1992_p7 = scmp.ne.s32.totalorder %s29_s27, %s1991_s7  ;;  %p1997_p9 = scmp.lt.s32.totalorder %s1991_s7, %s1991_s7 }
  0x53   :  { %p1998_p10 = por %p1997_p9, %p1996_p8 }
  0x55   :  { %p1999_p11 = pnand %p1998_p10, %p1992_p7 }
  0x57   :  { %2002 = shalt.err (!%p1999_p11)
}
  0x58   :  { %34 = dma.hbm_to_vmem [thread:$0]  %s2710_s0, 1024, %s29_s27, [#allocation3], %s2151_s25, %s2151_s25, %s2152_s26  }
  0x59   :  { %s2003_s14 = scalar_lea.hbm %s2712_s2, 256 }
  0x5a   :  { %p2004_p12 = scmp.ne.s32.totalorder %s2712_s2, %s2003_s14  ;;  %p2007_p13 = scmp.lt.u32.totalorder %s2003_s14, %s2712_s2 }
  0x5c   :  { %p2009_p0 = pnand %p2007_p13, %p2004_p12 }
  0x5e   :  { %2012 = shalt.err (!%p2009_p0)
}
  0x5f   :  { %s2013_s20 = scalar_lea.vmem %s2288_s29, 256  ;;  %p2018_p2 = scmp.lt.s32.totalorder %s2288_s29, %s2288_s29 }
  0x60   :  { %p2014_p1 = scmp.ne.s32.totalorder %s2288_s29, %s2013_s20  ;;  %p2019_p3 = scmp.lt.s32.totalorder %s2013_s20, %s2013_s20 }
  0x62   :  { %p2020_p4 = por %p2019_p3, %p2018_p2 }
  0x64   :  { %p2021_p5 = pnand %p2020_p4, %p2014_p1 }
  0x66   :  { %2024 = shalt.err (!%p2021_p5)
}
  0x67   :  { %58 = dma.hbm_to_vmem [thread:$0]  %s2712_s2, 256, %s2288_s29, [#allocation6], %s2151_s25, %s2151_s25, %s2152_s26  }
  0x68   :  { %s2157_s27 = smov [#allocation10]   ;;  %s2158_s30 = smov [#allocation13]  }
  0x69   :  { %s76_s28 = sshll.u32 %s2157_s27, 4  ;;  %s98_s11 = sshll.u32 %s2158_s30, 4  ;;  %s77_s28 = int_to_ptr.vmem [resolvable:$true] %s76_s28  ;;  %s2325_s11 = int_to_ptr.vmem [resolvable:$true] %s98_s11 }
  0x6a   :  { %s2025_s12 = scalar_lea.hbm %s2714_s4, 256 }
  0x6b   :  { %p2026_p6 = scmp.ne.s32.totalorder %s2714_s4, %s2025_s12  ;;  %p2029_p7 = scmp.lt.u32.totalorder %s2025_s12, %s2714_s4 }
  0x6d   :  { %p2031_p8 = pnand %p2029_p7, %p2026_p6 }
  0x6f   :  { %2034 = shalt.err (!%p2031_p8)
}
  0x70   :  { %s2035_s2 = scalar_lea.vmem %s77_s28, 256  ;;  %p2040_p10 = scmp.lt.s32.totalorder %s77_s28, %s77_s28 }
  0x71   :  { %p2036_p9 = scmp.ne.s32.totalorder %s77_s28, %s2035_s2  ;;  %p2041_p11 = scmp.lt.s32.totalorder %s2035_s2, %s2035_s2 }
  0x73   :  { %p2042_p12 = por %p2041_p11, %p2040_p10 }
  0x75   :  { %p2043_p13 = pnand %p2042_p12, %p2036_p9 }
  0x77   :  { %2046 = shalt.err (!%p2043_p13)
}
  0x78   :  { %82 = dma.hbm_to_vmem [thread:$0]  %s2714_s4, 256, %s77_s28, [#allocation9], %s2151_s25, %s2151_s25, %s2152_s26  }
  0x79   :  { %s2047_s14 = scalar_lea.hbm %s2716_s6, 256 }
  0x7a   :  { %p2048_p0 = scmp.ne.s32.totalorder %s2716_s6, %s2047_s14  ;;  %p2051_p1 = scmp.lt.u32.totalorder %s2047_s14, %s2716_s6 }
  0x7c   :  { %p2053_p2 = pnand %p2051_p1, %p2048_p0 }
  0x7e   :  { %2056 = shalt.err (!%p2053_p2)
}
  0x7f   :  { %s2057_s20 = scalar_lea.vmem %s2325_s11, 256  ;;  %p2062_p4 = scmp.lt.s32.totalorder %s2325_s11, %s2325_s11 }
  0x80   :  { %p2058_p3 = scmp.ne.s32.totalorder %s2325_s11, %s2057_s20  ;;  %p2063_p5 = scmp.lt.s32.totalorder %s2057_s20, %s2057_s20 }
  0x82   :  { %p2064_p6 = por %p2063_p5, %p2062_p4 }
  0x84   :  { %p2065_p7 = pnand %p2064_p6, %p2058_p3 }
  0x86   :  { %2068 = shalt.err (!%p2065_p7)
}
  0x87   :  { %104 = dma.hbm_to_vmem [thread:$0]  %s2716_s6, 256, %s2325_s11, [#allocation12], %s2151_s25, %s2151_s25, %s2152_s26  }
  0x88   :  { %s2159_s24 = smov [#allocation16]   ;;  %s2069_s3 = scalar_lea.hbm %s2718_s8, 16 }
  0x89   :  { %s123_s27 = sshll.u32 %s2159_s24, 4  ;;  %p2070_p8 = scmp.ne.s32.totalorder %s2718_s8, %s2069_s3  ;;  %s124_s27 = int_to_ptr.vmem [resolvable:$true] %s123_s27 }
  0x8a   :  { %p2073_p9 = scmp.lt.u32.totalorder %s2069_s3, %s2718_s8 }
  0x8c   :  { %p2075_p10 = pnand %p2073_p9, %p2070_p8 }
  0x8e   :  { %2078 = shalt.err (!%p2075_p10)
}
  0x8f   :  { %s2079_s7 = scalar_lea.vmem %s124_s27, 16  ;;  %s2083_s6 = scalar_lea.vmem %s124_s27, 32 }
  0x90   :  { %p2080_p11 = scmp.ne.s32.totalorder %s124_s27, %s2079_s7  ;;  %p2084_p12 = scmp.lt.s32.totalorder %s124_s27, %s124_s27 }
  0x91   :  { %p2085_p13 = scmp.lt.s32.totalorder %s2083_s6, %s2079_s7 }
  0x93   :  { %p2086_p0 = por %p2085_p13, %p2084_p12 }
  0x95   :  { %p2087_p1 = pnand %p2086_p0, %p2080_p11 }
  0x97   :  { %2090 = shalt.err (!%p2087_p1)
}
  0x98   :  { %126 = dma.hbm_to_vmem [thread:$0]  %s2718_s8, 16, %s124_s27, [#allocation15]  }
  0x99   :  { %2135 = dma.done.wait [#allocation3], 1024  }
  0x9a   :  { %2136 = vsyncadd [#allocation3], 4294966272 }
  0x9b   :  { %2137 = dma.done.wait [#allocation6], 3328  }
  0x9c   :  { %2138 = vsyncadd [#allocation6], 4294963968 }
  0x9d   :  { %2139 = dma.done.wait [#allocation9], 768  }
  0x9e   :  { %2140 = vsyncadd [#allocation9], 4294966528 }
  0x9f   :  { %2141 = dma.done.wait [#allocation12], 272  }
  0xa0   :  { %2142 = vsyncadd [#allocation12], 4294967024 }
  0xa1   :  { %2143 = dma.done.wait [#allocation15], 528  }
  0xa2   :  { %2144 = vsyncadd [#allocation15], 4294966768  ;;  %vm180_vm0 = vcmask 130048   ;;  %v178_v0 = vld [vmem:[#allocation7] sm:$0xff]  ;;  %v179_v1 = vld [vmem:[#allocation7 + $0x8] sm:$0xff]  ;;  %s2160_s8 = smov [#allocation17]  }
  0xa3   :  { %v154_v2 = vld [vmem:[#allocation5] sm:$0xff]  ;;  %v1762_v3 = vpack.c.bf16 %v179_v1, %v178_v0  ;;  %v155_v5 = vld [vmem:[#allocation5 + $0x8] sm:$0xff]  ;;  %v156_v7 = vld [vmem:[#allocation5 + $0x10] sm:$0xff]  ;;  %s1418_s2 = sshll.u32 %s2160_s8, 4  ;;  %s1419_s2 = int_to_ptr.vmem [resolvable:$true] %s1418_s2 }
  0xa4   :  { %1630 = vmatprep.mubr.msk.f32.mxu0 %vm180_vm0, %v154_v2  ;;  %v166_v4 = vld [vmem:[#allocation5 + $0x60] sm:$0xff]  ;;  %v167_v6 = vld [vmem:[#allocation5 + $0x68] sm:$0xff]  ;;  %v168_v8 = vld [vmem:[#allocation5 + $0x70] sm:$0xff]  ;;  %s2091_s29 = scalar_lea.vmem %s1419_s2, 1024  ;;  %p2096_p3 = scmp.lt.s32.totalorder %s1419_s2, %s1419_s2 }
  0xa5   :  { %1648 = vmatprep.mubr.msk.f32.mxu1 %vm180_vm0, %v166_v4  ;;  %1763 = vmatprep.subr.bf16.mxu0 %v1762_v3  ;;  %v157_v9 = vld [vmem:[#allocation5 + $0x18] sm:$0xff]  ;;  %v1106_v11 = vld [vmem:[#allocation13] sm:$0xff]  ;;  %v1107_v14 = vld [vmem:[#allocation13 + $0x8] sm:$0xff]  ;;  %p2092_p2 = scmp.ne.s32.totalorder %s1419_s2, %s2091_s29  ;;  %p2097_p4 = scmp.lt.s32.totalorder %s2091_s29, %s2091_s29 }
  0xa6   :  { %1790 = vmatprep.subr.bf16.mxu1 %v1762_v3  ;;  %1765 = vmatpush3.bf16.msra.mxu0 %v1762_v3  ;;  %v169_v10 = vld [vmem:[#allocation5 + $0x78] sm:$0xff]  ;;  %v158_v12 = vld [vmem:[#allocation5 + $0x20] sm:$0xff]  ;;  %v1786_v15 = vpack.c.bf16 %v1107_v14, %v1106_v11  ;;  %v159_v16 = vld [vmem:[#allocation5 + $0x28] sm:$0xff] }
  0xa7   :  { %1791 = vmatpush3.bf16.msra.mxu1 %v1762_v3  ;;  %v170_v13 = vld [vmem:[#allocation5 + $0x80] sm:$0xff]  ;;  %v171_v17 = vld [vmem:[#allocation5 + $0x88] sm:$0xff]  ;;  %v160_v18 = vld [vmem:[#allocation5 + $0x30] sm:$0xff]  ;;  %p2098_p5 = por %p2097_p4, %p2096_p3 }
  0xa8   :  { %v172_v19 = vld [vmem:[#allocation5 + $0x90] sm:$0xff]  ;;  %1787 = vmatprep.subr.bf16.mxu0 %v1786_v15  ;;  %v161_v20 = vld [vmem:[#allocation5 + $0x38] sm:$0xff]  ;;  %v162_v22 = vld [vmem:[#allocation5 + $0x40] sm:$0xff] }
  0xa9   :  { %1631 = vmatmul.mubr.msk.f32.vlgmr.msra.gmra.mrb[0].mxu0 %vm180_vm0, %v155_v5  ;;  %v173_v21 = vld [vmem:[#allocation5 + $0x98] sm:$0xff]  ;;  %v174_v23 = vld [vmem:[#allocation5 + $0xa0] sm:$0xff]  ;;  %v163_v24 = vld [vmem:[#allocation5 + $0x48] sm:$0xff]  ;;  %p2099_p6 = pnand %p2098_p5, %p2092_p2 }
  0xaa   :  { %1649 = vmatmul.mubr.msk.f32.vlgmr.msra.gmra.mrb[0].mxu1 %vm180_vm0, %v167_v6  ;;  %1633 = vmatprep.mubr.msk.f32.mxu0 %vm180_vm0, %v156_v7  ;;  %v175_v25 = vld [vmem:[#allocation5 + $0xa8] sm:$0xff]  ;;  %v164_v26 = vld [vmem:[#allocation5 + $0x50] sm:$0xff]  ;;  %v165_v28 = vld [vmem:[#allocation5 + $0x58] sm:$0xff] }
  0xab   :  { %1651 = vmatprep.mubr.msk.f32.mxu1 %vm180_vm0, %v168_v8  ;;  %1789 = vmatpush3.bf16.msra.mxu0 %v1786_v15  ;;  %v176_v27 = vld [vmem:[#allocation5 + $0xb0] sm:$0xff]  ;;  %v177_v29 = vld [vmem:[#allocation5 + $0xb8] sm:$0xff] }
  0xac   :  { %v578_v30 = vld [vmem:[#allocation10] sm:$0xff]  ;;  %v579_v31 = vld [vmem:[#allocation10 + $0x8] sm:$0xff] }
  0xad   :  { %1634 = vmatmul.mubr.msk.f32.gmra.mrb[2].mxu0 %vm180_vm0, %v157_v9  ;;  %v1766_v32 = vpack.c.bf16 %v579_v31, %v578_v30  ;;  %v574_v33 = vld [vmem:[#allocation8] sm:$0xff]  ;;  %v575_v34 = vld [vmem:[#allocation8 + $0x8] sm:$0xff] }
  0xae   :  { %1652 = vmatmul.mubr.msk.f32.gmra.mrb[2].mxu1 %vm180_vm0, %v169_v10  ;;  %1636 = vmatprep.mubr.msk.f32.mxu0 %vm180_vm0, %v158_v12  ;;  %v2398_v35 = vpack.c.bf16 %v575_v34, %v574_v33 }
  0xaf   :  { %1654 = vmatprep.mubr.msk.f32.mxu1 %vm180_vm0, %v170_v13  ;;  %1767 = vmatprep.subr.bf16.mxu1 %v1766_v32 }
  0xb0   :  { %1769 = vmatpush3.bf16.msra.mxu1 %v1766_v32 }
  0xb1   :  { %1637 = vmatmul.mubr.msk.f32.gmra.mrb[4].mxu0 %vm180_vm0, %v159_v16  ;;  %1771 = vmatprep.subr.bf16.mxu1 %v2398_v35 }
  0xb2   :  { %1655 = vmatmul.mubr.msk.f32.gmra.mrb[4].mxu1 %vm180_vm0, %v171_v17  ;;  %1639 = vmatprep.mubr.msk.f32.mxu0 %vm180_vm0, %v160_v18 }
  0xb3   :  { %1657 = vmatprep.mubr.msk.f32.mxu1 %vm180_vm0, %v172_v19 }
  0xb5   :  { %1640 = vmatmul.mubr.msk.f32.gmra.mrb[6].mxu0 %vm180_vm0, %v161_v20 }
  0xb6   :  { %1658 = vmatmul.mubr.msk.f32.gmra.mrb[6].mxu1 %vm180_vm0, %v173_v21  ;;  %1642 = vmatprep.mubr.msk.f32.mxu0 %vm180_vm0, %v162_v22 }
  0xb7   :  { %1660 = vmatprep.mubr.msk.f32.mxu1 %vm180_vm0, %v174_v23 }
  0xb9   :  { %1643 = vmatmul.mubr.msk.f32.gmra.mrb[8].mxu0 %vm180_vm0, %v163_v24 }
  0xba   :  { %1661 = vmatmul.mubr.msk.f32.gmra.mrb[8].mxu1 %vm180_vm0, %v175_v25  ;;  %1645 = vmatprep.mubr.msk.f32.mxu0 %vm180_vm0, %v164_v26 }
  0xbb   :  { %1663 = vmatprep.mubr.msk.f32.mxu1 %vm180_vm0, %v176_v27 }
  0xbd   :  { %1646 = vmatmul.mubr.msk.f32.gmra.mrb[10].mxu0 %vm180_vm0, %v165_v28 }
  0xbe   :  { %1664 = vmatmul.mubr.msk.f32.gmra.mrb[10].mxu1 %vm180_vm0, %v177_v29 }
 0x17c   :  { %v1632_v36 = vpop.f32.mrb[0].mxu0 }
 0x17d   :  { %v2401_v37 = vpop.f32.mrb[0].mxu1  ;;  %v319_v38 = vpop.f32.mrb[1].mxu0  ;;  %v439_v56 = vmul.f32 %v1632_v36, %v1632_v36 }
 0x17e   :  { %v2403_v39 = vpop.f32.mrb[1].mxu1  ;;  %1726 = vmatprep.mubr.msk.f32.mxu0 %vm180_vm0, %v319_v38  ;;  %v451_v43 = vmul.f32 %v2401_v37, %v2401_v37  ;;  %v438_v58 = vmul.f32 %v319_v38, %v319_v38 }
 0x17f   :  { %1727 = vmatmul.mubr.msk.f32.vlgmr.msra.gmra.mrb[12].mxu0 %vm180_vm0, %v1632_v36  ;;  %v450_v45 = vmul.f32 %v2403_v39, %v2403_v39  ;;  %v467_v9 = vsel %vm180_vm0, %v439_v56, 0.0 }
 0x180   :  { %v1635_v40 = vpop.f32.mrb[2].mxu0  ;;  %v488_v49 = vsel %vm180_vm0, %v451_v43, 0.0  ;;  %v462_v13 = vsel %vm180_vm0, %v438_v58, 0.0 }
 0x181   :  { %v2407_v41 = vpop.f32.mrb[2].mxu1  ;;  %v329_v42 = vpop.f32.mrb[3].mxu0  ;;  %v483_v54 = vsel %vm180_vm0, %v450_v45, 0.0  ;;  %v441_v59 = vmul.f32 %v1635_v40, %v1635_v40 }
 0x182   :  { %v2411_v44 = vpop.f32.mrb[3].mxu1  ;;  %1729 = vmatprep.mubr.msk.f32.mxu0 %vm180_vm0, %v329_v42  ;;  %v453_v51 = vmul.f32 %v2407_v41, %v2407_v41  ;;  %v440_v0 = vmul.f32 %v329_v42, %v329_v42 }
 0x183   :  { %1730 = vmatmul.mubr.msk.f32.gmra.mrb[14].mxu0 %vm180_vm0, %v1635_v40  ;;  %v452_v55 = vmul.f32 %v2411_v44, %v2411_v44  ;;  %v477_v14 = vsel %vm180_vm0, %v441_v59, 0.0 }
 0x184   :  { %v1638_v46 = vpop.f32.mrb[4].mxu0  ;;  %v498_v2 = vsel %vm180_vm0, %v453_v51, 0.0  ;;  %v472_v19 = vsel %vm180_vm0, %v440_v0, 0.0 }
 0x185   :  { %v2417_v47 = vpop.f32.mrb[4].mxu1  ;;  %v443_v48 = vmul.f32 %v1638_v46, %v1638_v46  ;;  %v339_v50 = vpop.f32.mrb[5].mxu0  ;;  %v493_v6 = vsel %vm180_vm0, %v452_v55, 0.0 }
 0x186   :  { %v2422_v52 = vpop.f32.mrb[5].mxu1  ;;  %v442_v53 = vmul.f32 %v339_v50, %v339_v50  ;;  %1732 = vmatprep.mubr.msk.f32.mxu0 %vm180_vm0, %v339_v50  ;;  %v455_v7 = vmul.f32 %v2417_v47, %v2417_v47 }
 0x187   :  { %v487_v57 = vsel %vm180_vm0, %v443_v48, 0.0  ;;  %1733 = vmatmul.mubr.msk.f32.gmra.mrb[16].mxu0 %vm180_vm0, %v1638_v46  ;;  %v454_v11 = vmul.f32 %v2422_v52, %v2422_v52 }
 0x188   :  { %v489_v60 = vadd.f32 %v488_v49, %v487_v57  ;;  %v482_v61 = vsel %vm180_vm0, %v442_v53, 0.0  ;;  %v1641_v62 = vpop.f32.mrb[6].mxu0  ;;  %v470_v25 = vsel %vm180_vm0, %v455_v7, 0.0 }
 0x189   :  { %v2431_v63 = vpop.f32.mrb[6].mxu1  ;;  %v484_v1 = vadd.f32 %v483_v54, %v482_v61  ;;  %v445_v3 = vmul.f32 %v1641_v62, %v1641_v62  ;;  %v349_v4 = vpop.f32.mrb[7].mxu0  ;;  %v465_v29 = vsel %vm180_vm0, %v454_v11, 0.0 }
 0x18a   :  { %v2434_v5 = vpop.f32.mrb[7].mxu1  ;;  %v444_v8 = vmul.f32 %v349_v4, %v349_v4  ;;  %1735 = vmatprep.mubr.msk.f32.mxu0 %vm180_vm0, %v349_v4  ;;  %v457_v12 = vmul.f32 %v2431_v63, %v2431_v63 }
 0x18b   :  { %v497_v10 = vsel %vm180_vm0, %v445_v3, 0.0  ;;  %1736 = vmatmul.mubr.msk.f32.gmra.mrb[18].mxu0 %vm180_vm0, %v1641_v62  ;;  %v456_v26 = vmul.f32 %v2434_v5, %v2434_v5 }
 0x18c   :  { %v499_v15 = vadd.f32 %v498_v2, %v497_v10  ;;  %v492_v16 = vsel %vm180_vm0, %v444_v8, 0.0  ;;  %v1644_v17 = vpop.f32.mrb[8].mxu0  ;;  %v480_v30 = vsel %vm180_vm0, %v457_v12, 0.0  ;;  %v576_v12 = vld [vmem:[#allocation8 + $0x10] sm:$0xff] }
 0x18d   :  { %v2450_v18 = vpop.f32.mrb[8].mxu1  ;;  %v494_v20 = vadd.f32 %v493_v6, %v492_v16  ;;  %v447_v21 = vmul.f32 %v1644_v17, %v1644_v17  ;;  %v359_v23 = vpop.f32.mrb[9].mxu0  ;;  %v475_v51 = vsel %vm180_vm0, %v456_v26, 0.0 }
 0x18e   :  { %v459_v22 = vmul.f32 %v2450_v18, %v2450_v18  ;;  %v2455_v24 = vpop.f32.mrb[9].mxu1  ;;  %v446_v27 = vmul.f32 %v359_v23, %v359_v23  ;;  %1738 = vmatprep.mubr.msk.f32.mxu0 %vm180_vm0, %v359_v23 }
 0x18f   :  { %v458_v28 = vmul.f32 %v2455_v24, %v2455_v24  ;;  %v468_v31 = vsel %vm180_vm0, %v447_v21, 0.0  ;;  %1739 = vmatmul.mubr.msk.f32.gmra.mrb[20].mxu0 %vm180_vm0, %v1644_v17 }
 0x190   :  { %v490_v32 = vsel %vm180_vm0, %v459_v22, 0.0  ;;  %v469_v33 = vadd.f32 %v468_v31, %v467_v9  ;;  %v463_v36 = vsel %vm180_vm0, %v446_v27, 0.0  ;;  %v1647_v40 = vpop.f32.mrb[10].mxu0 }
 0x191   :  { %v491_v34 = vadd.f32 %v490_v32, %v489_v60  ;;  %v485_v38 = vsel %vm180_vm0, %v458_v28, 0.0  ;;  %v2470_v42 = vpop.f32.mrb[10].mxu1  ;;  %v464_v43 = vadd.f32 %v463_v36, %v462_v13  ;;  %v449_v46 = vmul.f32 %v1647_v40, %v1647_v40  ;;  %v369_v49 = vpop.f32.mrb[11].mxu0 }
 0x192   :  { %v486_v45 = vadd.f32 %v485_v38, %v484_v1  ;;  %v461_v48 = vmul.f32 %v2470_v42, %v2470_v42  ;;  %v2474_v50 = vpop.f32.mrb[11].mxu1  ;;  %v471_v53 = vadd.f32 %v470_v25, %v469_v33  ;;  %v448_v54 = vmul.f32 %v369_v49, %v369_v49  ;;  %1741 = vmatprep.mubr.msk.f32.mxu0 %vm180_vm0, %v369_v49 }
 0x193   :  { %v460_v55 = vmul.f32 %v2474_v50, %v2474_v50  ;;  %v466_v56 = vadd.f32 %v465_v29, %v464_v43  ;;  %v478_v58 = vsel %vm180_vm0, %v449_v46, 0.0  ;;  %1742 = vmatmul.mubr.msk.f32.gmra.mrb[22].mxu0 %vm180_vm0, %v1647_v40  ;;  %v2492_v8 = vmax.f32 %v491_v34, 1e-08 }
 0x194   :  { %v2480_v57 = vmax.f32 %v486_v45, 1e-08  ;;  %v500_v59 = vsel %vm180_vm0, %v461_v48, 0.0  ;;  %v503_v60 = vmax.f32 %v471_v53, 1e-08  ;;  %v479_v61 = vadd.f32 %v478_v58, %v477_v14  ;;  %1744 = vmatprep.mubr.msk.f32.mxu0 %vm180_vm0, %v2403_v39  ;;  %v566_v53 = vld [vmem:[#allocation2] sm:$0xff] }
 0x195   :  { %v501_v62 = vadd.f32 %v500_v59, %v499_v15  ;;  %v473_v0 = vsel %vm180_vm0, %v448_v54, 0.0  ;;  %v502_v1 = vmax.f32 %v466_v56, 1e-08  ;;  %v495_v3 = vsel %vm180_vm0, %v460_v55, 0.0  ;;  %v567_v55 = vld [vmem:[#allocation2 + $0x8] sm:$0xff]  ;;  %v568_v56 = vld [vmem:[#allocation2 + $0x10] sm:$0xff] }
 0x196   :  { %v474_v2 = vadd.f32 %v473_v0, %v472_v19  ;;  %1813 = vrsqrt.f32 %v2480_v57  ;;  %v481_v4 = vadd.f32 %v480_v30, %v479_v61  ;;  %v496_v6 = vadd.f32 %v495_v3, %v494_v20  ;;  %v570_v58 = vld [vmem:[#allocation2 + $0x20] sm:$0xff]  ;;  %v571_v59 = vld [vmem:[#allocation2 + $0x28] sm:$0xff]  ;;  %v573_v61 = vld [vmem:[#allocation2 + $0x38] sm:$0xff] }
 0x197   :  { %1815 = vrsqrt.f32 %v503_v60  ;;  %1745 = vmatmul.mubr.msk.f32.gmra.mrb[24].mxu0 %vm180_vm0, %v2401_v37  ;;  %v2500_v11 = vmax.f32 %v501_v62, 1e-08  ;;  %vm519_vm1 = vcmp.eq.f32.partialorder %v503_v60, inf  ;;  %vm512_vm2 = vcmp.eq.f32.partialorder %v502_v1, inf  ;;  %v902_v62 = vld [vmem:[#allocation14] sm:$0xff]  ;;  %v903_v0 = vld [vmem:[#allocation14 + $0x8] sm:$0xff] }
 0x198   :  { %v476_v7 = vadd.f32 %v475_v51, %v474_v2  ;;  %1817 = vrsqrt.f32 %v502_v1  ;;  %v2494_v9 = vmax.f32 %v481_v4, 1e-08  ;;  %1747 = vmatprep.mubr.msk.f32.mxu0 %vm180_vm0, %v2411_v44  ;;  %v2498_v10 = vmax.f32 %v496_v6, 1e-08  ;;  %v904_v2 = vld [vmem:[#allocation14 + $0x10] sm:$0xff]  ;;  %v905_v3 = vld [vmem:[#allocation14 + $0x18] sm:$0xff] }
 0x199   :  { %vm514_vm3 = vcmp.eq.f32.partialorder %v502_v1, 0.0  ;;  %vm521_vm4 = vcmp.eq.f32.partialorder %v503_v60, 0.0  ;;  %vm540_vm5 = vcmp.eq.f32.partialorder %v2480_v57, inf  ;;  %v543_v36 = vand.u32 2147483648, %v2480_v57 }
 0x19a   :  { %v504_v39 = vmax.f32 %v476_v7, 1e-08  ;;  %1819 = vrsqrt.f32 %v2494_v9  ;;  %vm533_vm6 = vcmp.eq.f32.partialorder %v2494_v9, inf  ;;  %vm535_vm9 = vcmp.eq.f32.partialorder %v2494_v9, 0.0 }
 0x19b   :  { %1748 = vmatmul.mubr.msk.f32.gmra.mrb[26].mxu0 %vm180_vm0, %v2407_v41  ;;  %v577_v41 = vld [vmem:[#allocation8 + $0x18] sm:$0xff]  ;;  %vm542_vm10 = vcmp.eq.f32.partialorder %v2480_v57, 0.0  ;;  %vm547_vm11 = vcmp.eq.f32.partialorder %v2492_v8, inf  ;;  %vm554_vm12 = vcmp.eq.f32.partialorder %v2498_v10, inf  ;;  %v550_v45 = vand.u32 2147483648, %v2492_v8 }
 0x19c   :  { %1821 = vrsqrt.f32 %v504_v39  ;;  %1750 = vmatprep.mubr.msk.f32.mxu0 %vm180_vm0, %v2422_v52  ;;  %v515_v52 = vand.u32 2147483648, %v502_v1  ;;  %v1774_v17 = vpack.c.bf16 %v577_v41, %v576_v12  ;;  %vm526_vm7 = vcmp.eq.f32.partialorder %v504_v39, inf }
 0x19d   :  { %1823 = vrsqrt.f32 %v2492_v8  ;;  %v529_v28 = vand.u32 2147483648, %v504_v39  ;;  %vm528_vm8 = vcmp.eq.f32.partialorder %v504_v39, 0.0  ;;  %vm549_vm13 = vcmp.eq.f32.partialorder %v2492_v8, 0.0 }
 0x19e   :  { %1825 = vrsqrt.f32 %v2498_v10  ;;  %v557_v48 = vand.u32 2147483648, %v2498_v10  ;;  %vm556_vm14 = vcmp.eq.f32.partialorder %v2498_v10, 0.0  ;;  %vm561_vm15 = vcmp.eq.f32.partialorder %v2500_v11, inf }
 0x19f   :  { %1827 = vrsqrt.f32 %v2500_v11  ;;  %1751 = vmatmul.mubr.msk.f32.gmra.mrb[28].mxu0 %vm180_vm0, %v2417_v47  ;;  %v564_v51 = vand.u32 2147483648, %v2500_v11  ;;  %v1782_v4 = vpack.c.bf16 %v905_v3, %v904_v2 }
 0x1a0   :  { %v1814_v37 = vpop.eup %1813  ;;  %1753 = vmatprep.mubr.msk.f32.mxu0 %vm180_vm0, %v2434_v5  ;;  %v522_v5 = vand.u32 2147483648, %v503_v60 }
 0x1a1   :  { %v1816_v44 = vpop.eup %1815  ;;  %v539_v20 = vmul.f32 %v1814_v37, %v2480_v57 }
 0x1a2   :  { %v1818_v13 = vpop.eup %1817  ;;  %v518_v14 = vmul.f32 %v1816_v44, %v503_v60 }
 0x1a3   :  { %v511_v15 = vmul.f32 %v1818_v13, %v502_v1  ;;  %1754 = vmatmul.mubr.msk.f32.gmra.mrb[30].mxu0 %vm180_vm0, %v2431_v63  ;;  %v541_v33 = vsel %vm540_vm5, %v2480_v57, %v539_v20  ;;  %v569_v57 = vld [vmem:[#allocation2 + $0x18] sm:$0xff] }
 0x1a4   :  { %v520_v16 = vsel %vm519_vm1, %v503_v60, %v518_v14  ;;  %v1820_v19 = vpop.eup %1819  ;;  %1756 = vmatprep.mubr.msk.f32.mxu0 %vm180_vm0, %v2455_v24  ;;  %v536_v24 = vand.u32 2147483648, %v2494_v9  ;;  %v544_v38 = vsel %vm542_vm10, %v543_v36, %v541_v33  ;;  %vm563_vm1 = vcmp.eq.f32.partialorder %v2500_v11, 0.0  ;;  %v572_v60 = vld [vmem:[#allocation2 + $0x30] sm:$0xff] }
 0x1a5   :  { %v513_v47 = vsel %vm512_vm2, %v502_v1, %v511_v15  ;;  %v532_v23 = vmul.f32 %v1820_v19, %v2494_v9  ;;  %v523_v25 = vsel %vm521_vm4, %v522_v5, %v520_v16  ;;  %vm709_vm2 = vcmask 261120  }
 0x1a6   :  { %v1822_v21 = vpop.eup %1821  ;;  %v516_v22 = vsel %vm514_vm3, %v515_v52, %v513_v47  ;;  %v1778_v1 = vpack.c.bf16 %v903_v0, %v902_v62 }
 0x1a7   :  { %v1824_v63 = vpop.eup %1823  ;;  %1670 = vmatprep.mubr.msk.f32.mxu1 %vm180_vm0, %v516_v22  ;;  %v525_v26 = vmul.f32 %v1822_v21, %v504_v39  ;;  %1757 = vmatmul.mubr.msk.f32.gmra.mrb[32].mxu0 %vm180_vm0, %v2450_v18  ;;  %v534_v29 = vsel %vm533_vm6, %v2494_v9, %v532_v23 }
 0x1a8   :  { %v1826_v27 = vpop.eup %1825  ;;  %1671 = vmatmul.mubr.msk.f32.vlgmr.msra.gmra.mrb[12].mxu1 %vm180_vm0, %v523_v25  ;;  %v546_v30 = vmul.f32 %v1824_v63, %v2492_v8  ;;  %1759 = vmatprep.mubr.msk.f32.mxu0 %vm180_vm0, %v2474_v50  ;;  %v1490_v63 = vld [vmem:[#allocation11] ss:$0 sm:$0xff] }
 0x1a9   :  { %v1828_v31 = vpop.eup %1827  ;;  %1773 = vmatpush3.bf16.msra.mxu1 %v2398_v35  ;;  %v527_v32 = vsel %vm526_vm7, %v504_v39, %v525_v26  ;;  %v553_v18 = vmul.f32 %v1826_v27, %v2498_v10  ;;  %v537_v35 = vsel %vm535_vm9, %v536_v24, %v534_v29 }
 0x1aa   :  { %v530_v34 = vsel %vm528_vm8, %v529_v28, %v527_v32  ;;  %1775 = vmatprep.subr.bf16.mxu1 %v1774_v17  ;;  %v548_v40 = vsel %vm547_vm11, %v2492_v8, %v546_v30  ;;  %v560_v43 = vmul.f32 %v1828_v31, %v2500_v11 }
 0x1ab   :  { %1673 = vmatprep.mubr.msk.f32.mxu1 %vm180_vm0, %v530_v34  ;;  %1760 = vmatmul.mubr.msk.f32.gmra.mrb[34].mxu0 %vm180_vm0, %v2470_v42  ;;  %v555_v46 = vsel %vm554_vm12, %v2498_v10, %v553_v18  ;;  %v551_v49 = vsel %vm549_vm13, %v550_v45, %v548_v40 }
 0x1ac   :  { %1674 = vmatmul.mubr.msk.f32.gmra.mrb[14].mxu1 %vm180_vm0, %v537_v35  ;;  %v558_v42 = vsel %vm556_vm14, %v557_v48, %v555_v46  ;;  %v562_v50 = vsel %vm561_vm15, %v2500_v11, %v560_v43 }
 0x1ad   :  { %1676 = vmatprep.mubr.msk.f32.mxu1 %vm180_vm0, %v544_v38  ;;  %1777 = vmatpush3.bf16.msra.mxu1 %v1774_v17  ;;  %v565_v54 = vsel %vm563_vm1, %v564_v51, %v562_v50 }
 0x1ae   :  { %1779 = vmatprep.subr.bf16.mxu1 %v1778_v1 }
 0x1b0   :  { %1677 = vmatmul.mubr.msk.f32.gmra.mrb[16].mxu1 %vm180_vm0, %v551_v49 }
 0x1b1   :  { %1679 = vmatprep.mubr.msk.f32.mxu1 %vm180_vm0, %v558_v42 }
 0x1b4   :  { %1680 = vmatmul.mubr.msk.f32.gmra.mrb[18].mxu1 %vm180_vm0, %v565_v54 }
 0x1b5   :  { %1690 = vmatprep.mubr.msk.f32.mxu1 %vm709_vm2, %v566_v53 }
 0x1b8   :  { %1691 = vmatmul.mubr.msk.f32.vlgmr.msra.gmra.mrb[12].mxu1 %vm709_vm2, %v567_v55 }
 0x1b9   :  { %1693 = vmatprep.mubr.msk.f32.mxu1 %vm709_vm2, %v568_v56  ;;  %1781 = vmatpush3.bf16.msra.mxu1 %v1778_v1 }
 0x1ba   :  { %1783 = vmatprep.subr.bf16.mxu1 %v1782_v4 }
 0x1bc   :  { %1694 = vmatmul.mubr.msk.f32.gmra.mrb[14].mxu1 %vm709_vm2, %v569_v57 }
 0x1bd   :  { %1696 = vmatprep.mubr.msk.f32.mxu1 %vm709_vm2, %v570_v58  ;;  %1785 = vmatpush3.bf16.msra.mxu1 %v1782_v4 }
 0x1c0   :  { %1697 = vmatmul.mubr.msk.f32.gmra.mrb[16].mxu1 %vm709_vm2, %v571_v59 }
 0x1c1   :  { %1699 = vmatprep.mubr.msk.f32.mxu1 %vm709_vm2, %v572_v60 }
 0x1c4   :  { %1700 = vmatmul.mubr.msk.f32.gmra.mrb[18].mxu1 %vm709_vm2, %v573_v61 }
 0x252   :  { %v2568_v6 = vpop.f32.mrb[12].mxu0 }
 0x253   :  { %v2570_v7 = vpop.f32.mrb[13].mxu0 }
 0x256   :  { %v2572_v8 = vpop.f32.mrb[14].mxu0 }
 0x257   :  { %v2574_v9 = vpop.f32.mrb[15].mxu0 }
 0x25a   :  { %v2576_v39 = vpop.f32.mrb[16].mxu0 }
 0x25b   :  { %v2578_v10 = vpop.f32.mrb[17].mxu0 }
 0x25e   :  { %v2580_v11 = vpop.f32.mrb[18].mxu0 }
 0x25f   :  { %v2582_v37 = vpop.f32.mrb[19].mxu0 }
 0x262   :  { %v2584_v44 = vpop.f32.mrb[20].mxu0 }
 0x263   :  { %v2586_v12 = vpop.f32.mrb[21].mxu0 }
 0x266   :  { %v2588_v41 = vpop.f32.mrb[22].mxu0 }
 0x267   :  { %v2590_v13 = vpop.f32.mrb[23].mxu0 }
 0x26a   :  { %v2592_v14 = vpop.f32.mrb[24].mxu0 }
 0x26b   :  { %v2594_v15 = vpop.f32.mrb[25].mxu0 }
 0x26e   :  { %v2596_v52 = vpop.f32.mrb[26].mxu0 }
 0x26f   :  { %v2598_v16 = vpop.f32.mrb[27].mxu0 }
 0x272   :  { %v2600_v17 = vpop.f32.mrb[28].mxu0 }
 0x273   :  { %v2602_v19 = vpop.f32.mrb[29].mxu0 }
 0x276   :  { %v2604_v47 = vpop.f32.mrb[30].mxu0 }
 0x277   :  { %v2606_v5 = vpop.f32.mrb[31].mxu0 }
 0x27a   :  { %v2608_v20 = vpop.f32.mrb[32].mxu0 }
 0x27b   :  { %v2610_v21 = vpop.f32.mrb[33].mxu0 }
 0x27e   :  { %v2612_v22 = vpop.f32.mrb[34].mxu0 }
 0x27f   :  { %v2614_v23 = vpop.f32.mrb[35].mxu0 }
 0x28b   :  { %v1692_v25 = vpop.f32.mrb[12].mxu1 }
 0x28c   :  { %v847_v26 = vadd.f32 %v1692_v25, %v1490_v63  ;;  %v800_v24 = vpop.f32.mrb[13].mxu1 }
 0x28d   :  { %v846_v27 = vadd.f32 %v1490_v63, %v800_v24 }
 0x28e   :  { %v1492_v28 = vmul.f32 -1.442695, %v847_v26  ;;  %v1091_v29 = vmax.f32 %v847_v26, 0.0 }
 0x28f   :  { %v1491_v30 = vmul.f32 -1.442695, %v846_v27  ;;  %v1090_v31 = vmax.f32 %v846_v27, 0.0  ;;  %v1695_v32 = vpop.f32.mrb[14].mxu1 }
 0x290   :  { %1829 = vpow2.f32 %v1492_v28  ;;  %1099 = vst.msk [vmem:[#allocation17 + $0x8] sm:$0xff] %vm709_vm2, %v1091_v29  ;;  %v849_v33 = vadd.f32 %v1695_v32, %v1490_v63  ;;  %v810_v18 = vpop.f32.mrb[15].mxu1 }
 0x291   :  { %1831 = vpow2.f32 %v1491_v30  ;;  %1098 = vst.msk [vmem:[#allocation17] sm:$0xff] %vm709_vm2, %v1090_v31  ;;  %v848_v34 = vadd.f32 %v1490_v63, %v810_v18 }
 0x292   :  { %v1494_v36 = vmul.f32 -1.442695, %v849_v33  ;;  %v1093_v35 = vmax.f32 %v849_v33, 0.0 }
 0x293   :  { %v1493_v38 = vmul.f32 -1.442695, %v848_v34  ;;  %v1092_v40 = vmax.f32 %v848_v34, 0.0  ;;  %v1698_v43 = vpop.f32.mrb[16].mxu1 }
 0x294   :  { %1833 = vpow2.f32 %v1494_v36  ;;  %1101 = vst.msk [vmem:[#allocation17 + $0x18] sm:$0xff] %vm709_vm2, %v1093_v35  ;;  %v851_v45 = vadd.f32 %v1698_v43, %v1490_v63  ;;  %v820_v46 = vpop.f32.mrb[17].mxu1 }
 0x295   :  { %1835 = vpow2.f32 %v1493_v38  ;;  %1100 = vst.msk [vmem:[#allocation17 + $0x10] sm:$0xff] %vm709_vm2, %v1092_v40  ;;  %v850_v48 = vadd.f32 %v1490_v63, %v820_v46 }
 0x296   :  { %v1496_v49 = vmul.f32 -1.442695, %v851_v45  ;;  %v1095_v42 = vmax.f32 %v851_v45, 0.0 }
 0x297   :  { %v1495_v50 = vmul.f32 -1.442695, %v850_v48  ;;  %v1094_v51 = vmax.f32 %v850_v48, 0.0  ;;  %v1701_v53 = vpop.f32.mrb[18].mxu1 }
 0x298   :  { %1837 = vpow2.f32 %v1496_v49  ;;  %1103 = vst.msk [vmem:[#allocation17 + $0x28] sm:$0xff] %vm709_vm2, %v1095_v42  ;;  %v853_v54 = vadd.f32 %v1701_v53, %v1490_v63  ;;  %v830_v55 = vpop.f32.mrb[19].mxu1 }
 0x299   :  { %1839 = vpow2.f32 %v1495_v50  ;;  %1102 = vst.msk [vmem:[#allocation17 + $0x20] sm:$0xff] %vm709_vm2, %v1094_v51  ;;  %v852_v56 = vadd.f32 %v1490_v63, %v830_v55 }
 0x29a   :  { %v1830_v57 = vpop.eup %1829  ;;  %v1498_v58 = vmul.f32 -1.442695, %v853_v54  ;;  %v1097_v59 = vmax.f32 %v853_v54, 0.0 }
 0x29b   :  { %v1832_v60 = vpop.eup %1831  ;;  %v879_v61 = vadd.f32 1.0, %v1830_v57  ;;  %v1497_v62 = vmul.f32 -1.442695, %v852_v56  ;;  %v1096_v0 = vmax.f32 %v852_v56, 0.0 }
 0x29c   :  { %v878_v1 = vadd.f32 1.0, %v1832_v60  ;;  %1841 = vpow2.f32 %v1498_v58  ;;  %1105 = vst.msk [vmem:[#allocation17 + $0x38] sm:$0xff] %vm709_vm2, %v1097_v59 }
 0x29d   :  { %1843 = vrcp.f32 %v879_v61  ;;  %1104 = vst.msk [vmem:[#allocation17 + $0x30] sm:$0xff] %vm709_vm2, %v1096_v0 }
 0x29e   :  { %v1834_v2 = vpop.eup %1833  ;;  %1845 = vrcp.f32 %v878_v1 }
 0x29f   :  { %v1836_v3 = vpop.eup %1835  ;;  %v881_v4 = vadd.f32 1.0, %v1834_v2  ;;  %1847 = vpow2.f32 %v1497_v62 }
 0x2a0   :  { %v880_v63 = vadd.f32 1.0, %v1836_v3 }
 0x2a2   :  { %v1838_v25 = vpop.eup %1837  ;;  %1849 = vrcp.f32 %v880_v63 }
 0x2a3   :  { %v1840_v26 = vpop.eup %1839  ;;  %1851 = vrcp.f32 %v881_v4  ;;  %v883_v24 = vadd.f32 1.0, %v1838_v25 }
 0x2a4   :  { %v882_v27 = vadd.f32 1.0, %v1840_v26 }
 0x2a6   :  { %v1842_v28 = vpop.eup %1841  ;;  %1853 = vrcp.f32 %v882_v27 }
 0x2a7   :  { %v1844_v29 = vpop.eup %1843  ;;  %1855 = vrcp.f32 %v883_v24  ;;  %v885_v32 = vadd.f32 1.0, %v1842_v28 }
 0x2a8   :  { %v1846_v30 = vpop.eup %1845 }
 0x2a9   :  { %v1848_v31 = vpop.eup %1847  ;;  %1710 = vmatprep.mubr.msk.f32.mxu1 %vm709_vm2, %v1846_v30 }
 0x2aa   :  { %v884_v33 = vadd.f32 1.0, %v1848_v31  ;;  %1711 = vmatmul.mubr.msk.f32.vlgmr.msra.gmra.mrb[20].mxu1 %vm709_vm2, %v1844_v29 }
 0x2ac   :  { %v1850_v18 = vpop.eup %1849  ;;  %1857 = vrcp.f32 %v884_v33 }
 0x2ad   :  { %v1852_v34 = vpop.eup %1851  ;;  %1859 = vrcp.f32 %v885_v32  ;;  %1713 = vmatprep.mubr.msk.f32.mxu1 %vm709_vm2, %v1850_v18 }
 0x2ae   :  { %1714 = vmatmul.mubr.msk.f32.gmra.mrb[22].mxu1 %vm709_vm2, %v1852_v34 }
 0x2b0   :  { %v1854_v36 = vpop.eup %1853 }
 0x2b1   :  { %v1856_v35 = vpop.eup %1855  ;;  %1716 = vmatprep.mubr.msk.f32.mxu1 %vm709_vm2, %v1854_v36 }
 0x2b2   :  { %1717 = vmatmul.mubr.msk.f32.gmra.mrb[24].mxu1 %vm709_vm2, %v1856_v35 }
 0x2b6   :  { %v1858_v38 = vpop.eup %1857 }
 0x2b7   :  { %v1860_v40 = vpop.eup %1859  ;;  %1719 = vmatprep.mubr.msk.f32.mxu1 %vm709_vm2, %v1858_v38 }
 0x2b8   :  { %1720 = vmatmul.mubr.msk.f32.gmra.mrb[26].mxu1 %vm709_vm2, %v1860_v40 }
 0x2b9   :  { %2102 = shalt.err (!%p2099_p6)
}
 0x2ba   :  { %s2103_s1 = scalar_lea.hbm %s2719_s9, 1024 }
 0x2bb   :  { %p2104_p7 = scmp.ne.s32.totalorder %s2719_s9, %s2103_s1  ;;  %p2107_p8 = scmp.lt.u32.totalorder %s2103_s1, %s2719_s9 }
 0x2bd   :  { %p2109_p9 = pnand %p2107_p8, %p2104_p7 }
 0x2bf   :  { %2112 = shalt.err (!%p2109_p9)
}
 0x2c0   :  { %1424 = dma.vmem_to_hbm [thread:$0]  %s1419_s2, 1024, %s2719_s9, [#allocation4], %s2151_s25, %s2151_s25, %s2152_s26   ;;  %v1499_v43 = vld [vmem:[#allocation16] ss:$0 sm:$0xff] }
 0x2c1   :  { %s2161_s9 = smov [#allocation18]  }
 0x2c2   :  { %s1430_s4 = sshll.u32 %s2161_s9, 4  ;;  %s1431_s4 = int_to_ptr.vmem [resolvable:$true] %s1430_s4 }
 0x2c3   :  { %s2113_s0 = scalar_lea.vmem %s1431_s4, 3072  ;;  %p2118_p11 = scmp.lt.s32.totalorder %s1431_s4, %s1431_s4 }
 0x2c4   :  { %p2114_p10 = scmp.ne.s32.totalorder %s1431_s4, %s2113_s0  ;;  %p2119_p12 = scmp.lt.s32.totalorder %s2113_s0, %s2113_s0 }
 0x2c6   :  { %p2120_p13 = por %p2119_p12, %p2118_p11 }
 0x2c8   :  { %p2121_p0 = pnand %p2120_p13, %p2114_p10 }
 0x37d   :  { %v1712_v45 = vpop.f32.mrb[20].mxu1 }
 0x37e   :  { %v1009_v46 = vadd.f32 %v1712_v45, %v1499_v43  ;;  %v1003_v48 = vpop.f32.mrb[21].mxu1 }
 0x37f   :  { %v1004_v49 = vadd.f32 %v1499_v43, %v1003_v48 }
 0x380   :  { %v1509_v42 = vmul.f32 -1.442695, %v1009_v46 }
 0x381   :  { %v1508_v50 = vmul.f32 -1.442695, %v1004_v49  ;;  %v1715_v51 = vpop.f32.mrb[22].mxu1 }
 0x382   :  { %1861 = vpow2.f32 %v1509_v42  ;;  %v1019_v53 = vadd.f32 %v1715_v51, %v1499_v43  ;;  %v1013_v54 = vpop.f32.mrb[23].mxu1 }
 0x383   :  { %1863 = vpow2.f32 %v1508_v50  ;;  %v1014_v55 = vadd.f32 %v1499_v43, %v1013_v54 }
 0x384   :  { %v1511_v56 = vmul.f32 -1.442695, %v1019_v53 }
 0x385   :  { %v1510_v57 = vmul.f32 -1.442695, %v1014_v55  ;;  %v1718_v58 = vpop.f32.mrb[24].mxu1 }
 0x386   :  { %1865 = vpow2.f32 %v1511_v56  ;;  %v1029_v59 = vadd.f32 %v1718_v58, %v1499_v43  ;;  %v1023_v60 = vpop.f32.mrb[25].mxu1 }
 0x387   :  { %1867 = vpow2.f32 %v1510_v57  ;;  %v1024_v61 = vadd.f32 %v1499_v43, %v1023_v60 }
 0x388   :  { %v1513_v62 = vmul.f32 -1.442695, %v1029_v59 }
 0x389   :  { %v1512_v0 = vmul.f32 -1.442695, %v1024_v61 }
 0x38a   :  { %1869 = vpow2.f32 %v1513_v62 }
 0x38b   :  { %1871 = vpow2.f32 %v1512_v0  ;;  %v1721_v1 = vpop.f32.mrb[26].mxu1 }
 0x38c   :  { %v1862_v2 = vpop.eup %1861  ;;  %v1039_v3 = vadd.f32 %v1721_v1, %v1499_v43  ;;  %v1033_v4 = vpop.f32.mrb[27].mxu1 }
 0x38d   :  { %v1864_v63 = vpop.eup %1863  ;;  %v1067_v25 = vadd.f32 1.0, %v1862_v2  ;;  %v1034_v26 = vadd.f32 %v1499_v43, %v1033_v4 }
 0x38e   :  { %v1066_v24 = vadd.f32 1.0, %v1864_v63  ;;  %v1515_v27 = vmul.f32 -1.442695, %v1039_v3 }
 0x38f   :  { %1873 = vrcp.f32 %v1067_v25  ;;  %v1514_v28 = vmul.f32 -1.442695, %v1034_v26 }
 0x390   :  { %v1866_v29 = vpop.eup %1865  ;;  %1875 = vrcp.f32 %v1066_v24 }
 0x391   :  { %v1868_v30 = vpop.eup %1867  ;;  %v1069_v31 = vadd.f32 1.0, %v1866_v29  ;;  %1877 = vpow2.f32 %v1515_v27 }
 0x392   :  { %v1068_v32 = vadd.f32 1.0, %v1868_v30  ;;  %1879 = vpow2.f32 %v1514_v28 }
 0x393   :  { %1881 = vrcp.f32 %v1069_v31 }
 0x394   :  { %v1870_v33 = vpop.eup %1869  ;;  %1883 = vrcp.f32 %v1068_v32 }
 0x395   :  { %v1872_v18 = vpop.eup %1871  ;;  %v1071_v34 = vadd.f32 1.0, %v1870_v33 }
 0x396   :  { %v1070_v36 = vadd.f32 1.0, %v1872_v18 }
 0x397   :  { %1885 = vrcp.f32 %v1071_v34 }
 0x398   :  { %1887 = vrcp.f32 %v1070_v36 }
 0x399   :  { %v1874_v35 = vpop.eup %1873 }
 0x39a   :  { %v1876_v38 = vpop.eup %1875  ;;  %v1366_v40 = vmul.f32 %v1874_v35, %v2568_v6  ;;  %v1374_v43 = vmul.f32 %v1874_v35, %v2584_v44  ;;  %v1382_v45 = vmul.f32 %v1874_v35, %v2600_v17 }
 0x39b   :  { %v1878_v46 = vpop.eup %1877  ;;  %v1365_v48 = vmul.f32 %v1876_v38, %v2570_v7  ;;  %v1373_v49 = vmul.f32 %v1876_v38, %v2586_v12  ;;  %v1381_v42 = vmul.f32 %v1876_v38, %v2602_v19 }
 0x39c   :  { %v1880_v50 = vpop.eup %1879  ;;  %1390 = vst.msk [vmem:[#allocation18 + $0x8] sm:$0xff] %vm180_vm0, %v1366_v40  ;;  %1398 = vst.msk [vmem:[#allocation18 + $0x48] sm:$0xff] %vm180_vm0, %v1374_v43  ;;  %v1073_v51 = vadd.f32 1.0, %v1878_v46 }
 0x39d   :  { %1406 = vst.msk [vmem:[#allocation18 + $0x88] sm:$0xff] %vm180_vm0, %v1382_v45  ;;  %v1882_v6 = vpop.eup %1881  ;;  %1389 = vst.msk [vmem:[#allocation18] sm:$0xff] %vm180_vm0, %v1365_v48  ;;  %v1072_v7 = vadd.f32 1.0, %v1880_v50 }
 0x39e   :  { %1397 = vst.msk [vmem:[#allocation18 + $0x40] sm:$0xff] %vm180_vm0, %v1373_v49  ;;  %1405 = vst.msk [vmem:[#allocation18 + $0x80] sm:$0xff] %vm180_vm0, %v1381_v42  ;;  %v1884_v44 = vpop.eup %1883  ;;  %v1368_v12 = vmul.f32 %v1882_v6, %v2572_v8  ;;  %v1376_v17 = vmul.f32 %v1882_v6, %v2588_v41  ;;  %v1384_v19 = vmul.f32 %v1882_v6, %v2604_v47  ;;  %1889 = vrcp.f32 %v1073_v51 }
 0x39f   :  { %v1367_v53 = vmul.f32 %v1884_v44, %v2574_v9  ;;  %v1375_v54 = vmul.f32 %v1884_v44, %v2590_v13  ;;  %v1383_v55 = vmul.f32 %v1884_v44, %v2606_v5  ;;  %1891 = vrcp.f32 %v1072_v7 }
 0x3a0   :  { %1392 = vst.msk [vmem:[#allocation18 + $0x18] sm:$0xff] %vm180_vm0, %v1368_v12  ;;  %1400 = vst.msk [vmem:[#allocation18 + $0x58] sm:$0xff] %vm180_vm0, %v1376_v17 }
 0x3a1   :  { %1408 = vst.msk [vmem:[#allocation18 + $0x98] sm:$0xff] %vm180_vm0, %v1384_v19  ;;  %v1886_v56 = vpop.eup %1885  ;;  %1391 = vst.msk [vmem:[#allocation18 + $0x10] sm:$0xff] %vm180_vm0, %v1367_v53 }
 0x3a2   :  { %1399 = vst.msk [vmem:[#allocation18 + $0x50] sm:$0xff] %vm180_vm0, %v1375_v54  ;;  %1407 = vst.msk [vmem:[#allocation18 + $0x90] sm:$0xff] %vm180_vm0, %v1383_v55  ;;  %v1888_v8 = vpop.eup %1887  ;;  %v1370_v9 = vmul.f32 %v1886_v56, %v2576_v39  ;;  %v1378_v41 = vmul.f32 %v1886_v56, %v2592_v14  ;;  %v1386_v13 = vmul.f32 %v1886_v56, %v2608_v20 }
 0x3a3   :  { %v1369_v47 = vmul.f32 %v1888_v8, %v2578_v10  ;;  %v1377_v5 = vmul.f32 %v1888_v8, %v2594_v15  ;;  %v1385_v57 = vmul.f32 %v1888_v8, %v2610_v21 }
 0x3a4   :  { %1394 = vst.msk [vmem:[#allocation18 + $0x28] sm:$0xff] %vm180_vm0, %v1370_v9  ;;  %1402 = vst.msk [vmem:[#allocation18 + $0x68] sm:$0xff] %vm180_vm0, %v1378_v41 }
 0x3a5   :  { %1410 = vst.msk [vmem:[#allocation18 + $0xa8] sm:$0xff] %vm180_vm0, %v1386_v13  ;;  %1393 = vst.msk [vmem:[#allocation18 + $0x20] sm:$0xff] %vm180_vm0, %v1369_v47 }
 0x3a6   :  { %1401 = vst.msk [vmem:[#allocation18 + $0x60] sm:$0xff] %vm180_vm0, %v1377_v5  ;;  %1409 = vst.msk [vmem:[#allocation18 + $0xa0] sm:$0xff] %vm180_vm0, %v1385_v57 }
 0x3a8   :  { %v1890_v39 = vpop.eup %1889 }
 0x3a9   :  { %v1892_v10 = vpop.eup %1891  ;;  %v1372_v14 = vmul.f32 %v1890_v39, %v2580_v11  ;;  %v1380_v15 = vmul.f32 %v1890_v39, %v2596_v52  ;;  %v1388_v20 = vmul.f32 %v1890_v39, %v2612_v22 }
 0x3aa   :  { %v1371_v21 = vmul.f32 %v1892_v10, %v2582_v37  ;;  %v1379_v58 = vmul.f32 %v1892_v10, %v2598_v16  ;;  %v1387_v59 = vmul.f32 %v1892_v10, %v2614_v23 }
 0x3ab   :  { %1396 = vst.msk [vmem:[#allocation18 + $0x38] sm:$0xff] %vm180_vm0, %v1372_v14  ;;  %1404 = vst.msk [vmem:[#allocation18 + $0x78] sm:$0xff] %vm180_vm0, %v1380_v15 }
 0x3ac   :  { %1412 = vst.msk [vmem:[#allocation18 + $0xb8] sm:$0xff] %vm180_vm0, %v1388_v20  ;;  %1395 = vst.msk [vmem:[#allocation18 + $0x30] sm:$0xff] %vm180_vm0, %v1371_v21 }
 0x3ad   :  { %1403 = vst.msk [vmem:[#allocation18 + $0x70] sm:$0xff] %vm180_vm0, %v1379_v58  ;;  %1411 = vst.msk [vmem:[#allocation18 + $0xb0] sm:$0xff] %vm180_vm0, %v1387_v59 }
 0x3ae   :  { %2124 = shalt.err (!%p2121_p0)
}
 0x3af   :  { %s2125_s28 = scalar_lea.hbm %s2720_s10, 3072 }
 0x3b0   :  { %p2126_p1 = scmp.ne.s32.totalorder %s2720_s10, %s2125_s28  ;;  %p2129_p2 = scmp.lt.u32.totalorder %s2125_s28, %s2720_s10 }
 0x3b2   :  { %p2131_p3 = pnand %p2129_p2, %p2126_p1 }
 0x3b4   :  { %2134 = shalt.err (!%p2131_p3)
}
 0x3b5   :  { %1436 = dma.vmem_to_hbm [thread:$0]  %s1431_s4, 3072, %s2720_s10, [#allocation19], %s2151_s25, %s2151_s25, %s2152_s26  }
 0x3b6   :  { %2145 = dma.done.wait [#allocation4], 1024  }
 0x3b7   :  { %2146 = vsyncadd [#allocation4], 4294966272 }
 0x3b8   :  { %2147 = dma.done.wait [#allocation19], 3072  }
 0x3b9   :  { %2148 = vsyncadd [#allocation19], 4294964224 }
 0x3ba   :  { %1443 = vsyncpa [#allocation3], 1 }
 0x3bb   :  { %1444 = vsyncpa [#allocation6], 1 }
 0x3bc   :  { %1445 = vsyncpa [#allocation9], 1 }
 0x3bd   :  { %1446 = vsyncpa [#allocation12], 1 }
 0x3be   :  { %1447 = vsyncpa [#allocation15], 1 }
 0x3bf   :  { %1448 = vsyncpa [#allocation4], 1 }
 0x3c0   :  { %1449 = vsyncpa [#allocation19], 1 }

</bundles_post_ra>
